<compile_context>
chip_gen: v7x
topology: tpu7x:2x2x1
jax: 0.10.0
libtpu: 0.0.40
codegen_flags: <defaults>
</compile_context>

<pallas_src>
import jax
import jax.numpy as jnp
from jax.experimental import pallas as pl
from jax.experimental.pallas import tpu as pltpu


def transition_kernel(x_ref, scale_ref, shift_ref, w_ref, o_ref):
    # x_ref block : (1, 4, TM, C_p)  activations (bf16), 4 pooling-window quadrants
    # scale_ref   : (1, C_p) f32     folded eval-mode BN scale
    # shift_ref   : (1, C_p) f32     folded eval-mode BN shift
    # w_ref       : (C_p, Cout_p) bf16  1x1-conv weight with the 0.25 pool factor folded in
    # o_ref block : (1, TM, Cout_p)  bf16
    scale = scale_ref[...]          # (1, C_p): rely on implicit row broadcast
    shift = shift_ref[...]          # (no materialized broadcast_to -> less VMEM/VPU work)

    def bn_relu(q):                 # BN + ReLU in f32 on one contiguous quadrant slab
        v = x_ref[0, q].astype(jnp.float32)                        # (TM, C_p)
        return jnp.maximum(v * scale + shift, 0.0)

    # Tree-sum of the 4 quadrants (pool numerator; shorter add dependency chain).
    pooled = (bn_relu(0) + bn_relu(1)) + (bn_relu(2) + bn_relu(3))

    # Single MXU matmul: bf16 operands, f32 accumulation.  (TM, C_p) @ (C_p, Cout_p)
    out = jnp.dot(pooled.astype(jnp.bfloat16), w_ref[...],
                  preferred_element_type=jnp.float32)
    o_ref[0] = out.astype(o_ref.dtype)


def _vmem_capacity_bytes():
    """Physical VMEM of the attached TPU generation (conservative fallback)."""
    try:
        info = pltpu.get_tpu_info()
        cap = getattr(info, "vmem_capacity_bytes", None)
        if cap:
            return int(cap)
    except Exception:
        pass
    return 64 << 20                 # assume v7x-class (smallest VMEM) if unknown


def transition_forward(x_nchw, gamma, beta, running_mean, running_var, conv_w,
                       eps=1e-5):
    """Pallas implementation of Transition.forward (eval-mode BatchNorm)."""
    N, C, H, W = x_nchw.shape
    assert H % 2 == 0 and W % 2 == 0, \
        "kernel requires even H/W (PyTorch avg_pool2d floors odd sizes)"
    Cout = conv_w.shape[0]
    H2, W2 = H // 2, W // 2
    M_total = H2 * W2
    LANE = 128

    # Activations travel HBM<->VMEM in bf16 (halves the dominant HBM traffic);
    # BN/ReLU math is done in f32 inside the kernel.
    if x_nchw.dtype in (jnp.float32, jnp.float64):
        act_dtype = jnp.bfloat16
    else:
        act_dtype = x_nchw.dtype
    act_bytes = jnp.dtype(act_dtype).itemsize

    # Pad input channels to a lane multiple only when that padding is cheap.
    if C > LANE and C % LANE != 0:
        C_p = ((C + LANE - 1) // LANE) * LANE
    else:
        C_p = C
    Cout_p = ((Cout + LANE - 1) // LANE) * LANE

    # ---- Fold BN (eval mode) into per-channel scale/shift (f32). -------------
    inv_std = 1.0 / jnp.sqrt(running_var.astype(jnp.float32) + eps)
    g32 = gamma.astype(jnp.float32)
    scale = (g32 * inv_std).reshape(1, C)
    shift = (beta.astype(jnp.float32)
             - running_mean.astype(jnp.float32) * g32 * inv_std).reshape(1, C)
    if C_p > C:
        scale = jnp.pad(scale, ((0, 0), (0, C_p - C)))
        shift = jnp.pad(shift, ((0, 0), (0, C_p - C)))

    # ---- 1x1 conv -> matmul weight, fold 0.25 pool factor, pad, bf16. --------
    w_mat = (conv_w.reshape(Cout, C).astype(jnp.float32).T * 0.25).astype(jnp.bfloat16)
    w_mat = jnp.pad(w_mat, ((0, C_p - C), (0, Cout_p - Cout)))     # (C_p, Cout_p)

    # ---- Quadrant-separated channels-last layout (single XLA transpose, bf16). -
    # TODO(synk): if the surrounding DenseNet block can keep activations in this
    # channels-last / quadrant layout across layers, this transpose and the final
    # NHWC->NCHW transpose (each a full HBM read+write) can be dropped entirely.
    xq = x_nchw.reshape(N, C, H2, 2, W2, 2)
    xq = jnp.transpose(xq, (0, 3, 5, 2, 4, 1))                     # (N, 2, 2, H2, W2, C)
    xq = xq.reshape(N, 4, M_total, C).astype(act_dtype)
    if C_p > C:
        xq = jnp.pad(xq, ((0, 0), (0, 0), (0, 0), (0, C_p - C)))

    # ---- Per-generation VMEM budget -> tile size TM (pooled pixels / step). ---
    vmem_cap = _vmem_capacity_bytes()
    if vmem_cap >= (100 << 20):        # v5e / v6e: 128 MiB physical VMEM
        input_block_budget = 14 << 20
        vmem_limit_max = 96 << 20
    else:                              # v7x: 64 MiB per TensorCore
        input_block_budget = 6 << 20
        vmem_limit_max = 44 << 20

    def vmem_need(tm):
        io = (2 * (4 * tm * C_p * act_bytes)        # double-buffered input blocks
              + 2 * (tm * Cout_p * 2)               # double-buffered bf16 output blocks
              + 2 * (C_p * Cout_p * 2)              # (double-buffered) bf16 weight
              + 2 * 2 * (C_p * 4))                  # scale / shift
        internal = (5 * tm * C_p * 4                # f32 BN/ReLU temps + pooled accumulator
                    + tm * C_p * 2                  # bf16 pooled copy for the MXU
                    + tm * Cout_p * 4)              # f32 matmul accumulator
        return io + internal

    cap_tm = max(8, input_block_budget // max(1, 4 * C_p * act_bytes))
    # Keep >= ~8 grid steps overall so both v7x TensorCores get work and the DMA
    # pipeline has something to overlap with, even at small batch.
    min_steps_per_image = max(1, -(-8 // N))
    tm_target = -(-M_total // min_steps_per_image)

    if M_total <= 8:
        TM = M_total                                 # full dim (allowed even if not %8)
    else:
        TM = min(cap_tm, tm_target, M_total)
        while TM > 8 and vmem_need(TM) > vmem_limit_max:
            TM //= 2                                 # shrink if internals + IO overflow
        if TM < M_total:
            TM = min(M_total, max(8, (TM // 8) * 8)) # sublane-aligned; cdiv handles tail
    grid_m = int(pl.cdiv(M_total, TM))

    vmem_limit = int(min(max(vmem_need(TM) + (2 << 20), 16 << 20), vmem_limit_max))

    out_flat = pl.pallas_call(
        transition_kernel,
        out_shape=jax.ShapeDtypeStruct((N, M_total, Cout_p), act_dtype),
        grid_spec=pltpu.PrefetchScalarGridSpec(
            num_scalar_prefetch=0,
            grid=(N, grid_m),
            in_specs=[
                pl.BlockSpec((1, 4, TM, C_p), lambda n, m: (n, 0, m, 0)),
                pl.BlockSpec((1, C_p), lambda n, m: (0, 0)),
                pl.BlockSpec((1, C_p), lambda n, m: (0, 0)),
                pl.BlockSpec((C_p, Cout_p), lambda n, m: (0, 0)),
            ],
            out_specs=pl.BlockSpec((1, TM, Cout_p), lambda n, m: (n, m, 0)),
        ),
        compiler_params=pltpu.CompilerParams(
            dimension_semantics=("parallel", "parallel"),
            vmem_limit_bytes=vmem_limit,
        ),
    )(xq, scale, shift, w_mat)

    # Drop channel padding, restore spatial dims, back to PyTorch NCHW layout/dtype.
    out = out_flat[:, :, :Cout].reshape(N, H2, W2, Cout)
    return jnp.transpose(out, (0, 3, 1, 2)).astype(x_nchw.dtype)


def transition_reference(x_nchw, gamma, beta, running_mean, running_var, conv_w,
                         eps=1e-5):
    """Plain-JAX f32 reference matching PyTorch eval-mode forward (conv then pool)."""
    xn = (x_nchw - running_mean[None, :, None, None]) / jnp.sqrt(
        running_var[None, :, None, None] + eps)
    xn = xn * gamma[None, :, None, None] + beta[None, :, None, None]
    xr = jnp.maximum(xn, 0.0)
    w2d = conv_w.reshape(conv_w.shape[0], conv_w.shape[1])         # (Cout, Cin)
    y = jnp.einsum("nchw,oc->nohw", xr, w2d)
    N, Co, H, W = y.shape
    return y.reshape(N, Co, H // 2, 2, W // 2, 2).mean(axis=(3, 5))


if __name__ == "__main__":
    # Small, deterministic problem: Transition(nChannels=4, nOutChannels=8)
    N, C, H, W = 2, 4, 16, 16
    Cout = 8

    key = jax.random.PRNGKey(0)
    kx, kg, kb, km, kv, kw = jax.random.split(key, 6)

    x = jax.random.normal(kx, (N, C, H, W), dtype=jnp.float32)
    gamma = 1.0 + 0.1 * jax.random.normal(kg, (C,), dtype=jnp.float32)
    beta = 0.1 * jax.random.normal(kb, (C,), dtype=jnp.float32)
    running_mean = 0.1 * jax.random.normal(km, (C,), dtype=jnp.float32)
    running_var = jnp.abs(jax.random.normal(kv, (C,), dtype=jnp.float32)) + 0.5
    conv_w = (1.0 / jnp.sqrt(C)) * jax.random.normal(kw, (Cout, C, 1, 1), dtype=jnp.float32)

    out = transition_forward(x, gamma, beta, running_mean, running_var, conv_w)
    out = jax.block_until_ready(out)

    ref = transition_reference(x, gamma, beta, running_mean, running_var, conv_w)

    assert out.shape == (N, Cout, H // 2, W // 2), out.shape
    max_err = float(jnp.max(jnp.abs(out - ref)))
    # bf16 activations + bf16 MXU operands + bf16 output (f32 accumulation)
    # -> looser tolerance than pure f32.
    assert jnp.allclose(out, ref, atol=6e-2, rtol=6e-2), max_err

    print("KERNEL_OK")
</pallas_src>

<mosaic_0001>
module attributes {stable_mosaic.version = 11 : i64} {
  func.func @transition_kernel(%arg0: i32, %arg1: i32, %arg2: memref<1x4x16x4xbf16, #tpu.memory_space<vmem>>, %arg3: memref<1x4xf32, #tpu.memory_space<vmem>>, %arg4: memref<1x4xf32, #tpu.memory_space<vmem>>, %arg5: memref<4x128xbf16, #tpu.memory_space<vmem>>, %arg6: memref<1x16x128xbf16, #tpu.memory_space<vmem>>) attributes {dimension_semantics = [#tpu.dimension_semantics<parallel>, #tpu.dimension_semantics<parallel>], iteration_bounds = array<i64: 2, 4>, scalar_prefetch = 0 : i64, scratch_operands = 0 : i64, tpu.core_type = #tpu.core_type<tc>, window_params = [{transform_indices = @transform_0, window_bounds = array<i64: 1, 4, 16, 4>}, {pipeline_mode = #tpu.pipeline_mode<synchronous>, transform_indices = @transform_1, window_bounds = array<i64: 1, 4>}, {pipeline_mode = #tpu.pipeline_mode<synchronous>, transform_indices = @transform_2, window_bounds = array<i64: 1, 4>}, {pipeline_mode = #tpu.pipeline_mode<synchronous>, transform_indices = @transform_3, window_bounds = array<i64: 4, 128>}, {transform_indices = @transform_4, window_bounds = array<i64: 1, 16, 128>}]} {
    %c0 = arith.constant 0 : index
    %c0_0 = arith.constant 0 : index
    %0 = vector.load %arg3[%c0, %c0_0] : memref<1x4xf32, #tpu.memory_space<vmem>>, vector<1x4xf32>
    %c0_1 = arith.constant 0 : index
    %c0_2 = arith.constant 0 : index
    %1 = vector.load %arg4[%c0_1, %c0_2] : memref<1x4xf32, #tpu.memory_space<vmem>>, vector<1x4xf32>
    %c0_3 = arith.constant 0 : index
    %c0_4 = arith.constant 0 : index
    %c0_5 = arith.constant 0 : index
    %c0_6 = arith.constant 0 : index
    %2 = vector.load %arg2[%c0_3, %c0_4, %c0_5, %c0_6] : memref<1x4x16x4xbf16, #tpu.memory_space<vmem>>, vector<1x1x16x4xbf16>
    %3 = vector.shape_cast %2 : vector<1x1x16x4xbf16> to vector<16x4xbf16>
    %4 = arith.extf %3 : vector<16x4xbf16> to vector<16x4xf32>
    %5 = vector.broadcast %0 : vector<1x4xf32> to vector<16x4xf32>
    %6 = arith.mulf %4, %5 : vector<16x4xf32>
    %7 = vector.broadcast %1 : vector<1x4xf32> to vector<16x4xf32>
    %8 = arith.addf %6, %7 : vector<16x4xf32>
    %cst = arith.constant 0.000000e+00 : f32
    %9 = vector.broadcast %cst : f32 to vector<16x4xf32>
    %10 = arith.maximumf %8, %9 : vector<16x4xf32>
    %c0_7 = arith.constant 0 : index
    %c1 = arith.constant 1 : index
    %c0_8 = arith.constant 0 : index
    %c0_9 = arith.constant 0 : index
    %11 = vector.load %arg2[%c0_7, %c1, %c0_8, %c0_9] : memref<1x4x16x4xbf16, #tpu.memory_space<vmem>>, vector<1x1x16x4xbf16>
    %12 = vector.shape_cast %11 : vector<1x1x16x4xbf16> to vector<16x4xbf16>
    %13 = arith.extf %12 : vector<16x4xbf16> to vector<16x4xf32>
    %14 = vector.broadcast %0 : vector<1x4xf32> to vector<16x4xf32>
    %15 = arith.mulf %13, %14 : vector<16x4xf32>
    %16 = vector.broadcast %1 : vector<1x4xf32> to vector<16x4xf32>
    %17 = arith.addf %15, %16 : vector<16x4xf32>
    %cst_10 = arith.constant 0.000000e+00 : f32
    %18 = vector.broadcast %cst_10 : f32 to vector<16x4xf32>
    %19 = arith.maximumf %17, %18 : vector<16x4xf32>
    %20 = arith.addf %10, %19 : vector<16x4xf32>
    %c0_11 = arith.constant 0 : index
    %c2 = arith.constant 2 : index
    %c0_12 = arith.constant 0 : index
    %c0_13 = arith.constant 0 : index
    %21 = vector.load %arg2[%c0_11, %c2, %c0_12, %c0_13] : memref<1x4x16x4xbf16, #tpu.memory_space<vmem>>, vector<1x1x16x4xbf16>
    %22 = vector.shape_cast %21 : vector<1x1x16x4xbf16> to vector<16x4xbf16>
    %23 = arith.extf %22 : vector<16x4xbf16> to vector<16x4xf32>
    %24 = vector.broadcast %0 : vector<1x4xf32> to vector<16x4xf32>
    %25 = arith.mulf %23, %24 : vector<16x4xf32>
    %26 = vector.broadcast %1 : vector<1x4xf32> to vector<16x4xf32>
    %27 = arith.addf %25, %26 : vector<16x4xf32>
    %cst_14 = arith.constant 0.000000e+00 : f32
    %28 = vector.broadcast %cst_14 : f32 to vector<16x4xf32>
    %29 = arith.maximumf %27, %28 : vector<16x4xf32>
    %c0_15 = arith.constant 0 : index
    %c3 = arith.constant 3 : index
    %c0_16 = arith.constant 0 : index
    %c0_17 = arith.constant 0 : index
    %30 = vector.load %arg2[%c0_15, %c3, %c0_16, %c0_17] : memref<1x4x16x4xbf16, #tpu.memory_space<vmem>>, vector<1x1x16x4xbf16>
    %31 = vector.shape_cast %30 : vector<1x1x16x4xbf16> to vector<16x4xbf16>
    %32 = arith.extf %31 : vector<16x4xbf16> to vector<16x4xf32>
    %33 = vector.broadcast %0 : vector<1x4xf32> to vector<16x4xf32>
    %34 = arith.mulf %32, %33 : vector<16x4xf32>
    %35 = vector.broadcast %1 : vector<1x4xf32> to vector<16x4xf32>
    %36 = arith.addf %34, %35 : vector<16x4xf32>
    %cst_18 = arith.constant 0.000000e+00 : f32
    %37 = vector.broadcast %cst_18 : f32 to vector<16x4xf32>
    %38 = arith.maximumf %36, %37 : vector<16x4xf32>
    %39 = arith.addf %29, %38 : vector<16x4xf32>
    %40 = arith.addf %20, %39 : vector<16x4xf32>
    %41 = arith.truncf %40 : vector<16x4xf32> to vector<16x4xbf16>
    %c0_19 = arith.constant 0 : index
    %c0_20 = arith.constant 0 : index
    %42 = vector.load %arg5[%c0_19, %c0_20] : memref<4x128xbf16, #tpu.memory_space<vmem>>, vector<4x128xbf16>
    %cst_21 = arith.constant dense<0.000000e+00> : vector<16x128xf32>
    %43 = tpu.matmul %41, %42, %cst_21 {dimension_numbers = #tpu.dot_dimension_numbers<[1], [0], [0], [1], [0, 0, 1, 1], [], []>} : vector<16x4xbf16>, vector<4x128xbf16>, vector<16x128xf32> -> vector<16x128xf32>
    %44 = arith.truncf %43 : vector<16x128xf32> to vector<16x128xbf16>
    %c0_22 = arith.constant 0 : index
    %c0_23 = arith.constant 0 : index
    %c0_24 = arith.constant 0 : index
    %45 = vector.load %arg6[%c0_22, %c0_23, %c0_24] : memref<1x16x128xbf16, #tpu.memory_space<vmem>>, vector<1x16x128xbf16>
    %46 = vector.shape_cast %45 : vector<1x16x128xbf16> to vector<16x128xbf16>
    %47 = vector.shape_cast %44 : vector<16x128xbf16> to vector<1x16x128xbf16>
    tpu.vector_store %arg6[%c0_22, %c0_23, %c0_24], %47 {strides = array<i32>} : memref<1x16x128xbf16, #tpu.memory_space<vmem>>, vector<1x16x128xbf16>,
    return
  }
  func.func @transform_0(%arg0: i32, %arg1: i32) -> (i32, i32, i32, i32) {
    %c0_i32 = arith.constant 0 : i32
    %c0_i32_0 = arith.constant 0 : i32
    %c0_i32_1 = arith.constant 0 : i32
    return %arg0, %c0_i32, %arg1, %c0_i32_0 : i32, i32, i32, i32
  }
  func.func @transform_1(%arg0: i32, %arg1: i32) -> (i32, i32) {
    %c0_i32 = arith.constant 0 : i32
    %c0_i32_0 = arith.constant 0 : i32
    %c0_i32_1 = arith.constant 0 : i32
    return %c0_i32, %c0_i32_0 : i32, i32
  }
  func.func @transform_2(%arg0: i32, %arg1: i32) -> (i32, i32) {
    %c0_i32 = arith.constant 0 : i32
    %c0_i32_0 = arith.constant 0 : i32
    %c0_i32_1 = arith.constant 0 : i32
    return %c0_i32, %c0_i32_0 : i32, i32
  }
  func.func @transform_3(%arg0: i32, %arg1: i32) -> (i32, i32) {
    %c0_i32 = arith.constant 0 : i32
    %c0_i32_0 = arith.constant 0 : i32
    %c0_i32_1 = arith.constant 0 : i32
    return %c0_i32, %c0_i32_0 : i32, i32
  }
  func.func @transform_4(%arg0: i32, %arg1: i32) -> (i32, i32, i32) {
    %c0_i32 = arith.constant 0 : i32
    %c0_i32_0 = arith.constant 0 : i32
    return %arg0, %arg1, %c0_i32 : i32, i32, i32
  }
}

</mosaic_0001>

<bundles_post_ra>
// kernel: tpu_custom_call.1
= control target key start
LH: loop header
LB: loop body
LE: loop exit
PB: predicated region body
PF: predicated region fallthrough
CT: control target
= control target key end

     0   :  { %9 = vsyncpa [#allocation4], 0  ;;  %s935_s0 = inlined_call_operand.vmem [shape: bf16[2,4,64,4], index: 0, kind: input, shape index: {}]   ;;  %s936_s1 = inlined_call_operand.vmem [shape: f32[1,4], index: 1, kind: input, shape index: {}]   ;;  %s937_s2 = inlined_call_operand.vmem [shape: f32[1,4], index: 2, kind: input, shape index: {}]   ;;  %s938_s3 = inlined_call_operand.vmem [shape: bf16[4,128], index: 3, kind: input, shape index: {}]   ;;  %s939_s4 = inlined_call_operand.hbm [shape: bf16[2,64,128], index: 4, kind: output, shape index: {}]  }
   0x1   :  { %11 = vsyncpa [#allocation4 + $0x1], 0  ;;  %s775_s15 = smov 0   ;;  %s777_s16 = smov 0  }
   0x2   :  { %s779_s17 = smov 0   ;;  %s781_s18 = smov 0  }
   0x3   :  { %s783_s19 = smov 0   ;;  %s785_s20 = smov 0  }
   0x4   :  { %s787_s21 = smov 0   ;;  %s789_s22 = smov 0  }
   0x5 LB: > { %s512_s23 = sadd.s32 4294967295, %s743_s22   ;;  %s513_s24 = sadd.s32 4294967294, %s743_s22   ;;  %s743_s22 = sphi %s789_s22, %s17_s22   ;;  %s739_s21 = sphi %s787_s21, %s949_s21   ;;  %s735_s20 = sphi %s785_s20, %s948_s20   ;;  %s731_s19 = sphi %s783_s19, %s947_s19   ;;  %s727_s18 = sphi %s781_s18, %s946_s18   ;;  %s723_s17 = sphi %s779_s17, %s945_s17   ;;  %s719_s16 = sphi %s777_s16, %s944_s16   ;;  %s715_s15 = sphi %s775_s15, %s943_s15  }
   0x6   : > { %s26_s25 = sadd.s32 1, %s735_s20  ;;  %s29_s26 = sadd.s32 1, %s739_s21 }
   0x7   : > { %p27_p0 = scmp.ge.s32.totalorder %s26_s25, 4  ;;  %p45_p1 = scmp.ne.s32.totalorder %s723_s17, %s719_s16 }
   0x8   : > { %p46_p2 = scmp.eq.s32.totalorder %s743_s22, 0  ;;  %p140_p5 = scmp.eq.s32.totalorder %s512_s23, 7 }
   0x9   : > { %s951_s25 = smov (%p27_p0, %s26_s25), 0  ;;  %s953_s26 = smov (!%p27_p0, %s29_s26), %s739_s21 }
   0xa   : > { %s34_s27 = ssub.s32 %s735_s20, %s951_s25  ;;  %p827_p3 = por %p46_p2, %p45_p1 }
   0xb   : > { %p31_p4 = scmp.ge.s32.totalorder %s953_s26, 2  ;;  %p145_p6 = scmp.ne.s32.totalorder %s719_s16, %s715_s15 }
   0xc   : > { %p146_p7 = scmp.eq.s32.totalorder %s513_s24, 7  ;;  %p835_p8 = por %p140_p5, %p45_p1 }
   0xd   : > { %s955_s26 = smov (%p31_p4, %s953_s26), 0  ;;  %s38_s7 = sadd.s32 1, %s723_s17 }
   0xe   : > { %p839_p9 = por %p146_p7, %p145_p6  ;;  %s33_s5 = ssub.s32 %s739_s21, %s955_s26 }
   0xf   : > { %s35_s6 = sor.u32 %s34_s27, %s33_s5  ;;  %p515_p11 = scmp.ge.s32.totalorder %s743_s22, 8 }
  0x10   : > { %p36_p10 = scmp.eq.s32.totalorder %s35_s6, 0 }
  0x11   : > { %171 = sbr.rel (%p515_p11) target bundleno = 35 (0x23), region = 28 }
  0x12   : > { %s847_s8 = scalar_select %p36_p10, %s723_s17, %s38_s7  }
  0x18   : > { %174 = sbr.rel (!%p827_p3) target bundleno = 35 (0x23), region = 32  ;;  %s176_s9 = sand.u32 (%p827_p3), 1, %s723_s17  }
  0x19   : > { %s517_s10 = sshll.u32 (%p827_p3), %s735_s20, 1  ;;  %s516_s11 = sshll.u32 (%p827_p3), %s176_s9, 5 }
  0x1a   : > { %s518_s12 = sshll.u32 (%p827_p3), %s739_s21, 5  ;;  %s178_s5 = scalar_lea.vmem (%p827_p3), [#allocation2], %s516_s11 }
  0x1b   : > { %s181_s13 = sadd.s32 (%p827_p3), %s518_s12, %s517_s10 }
  0x1c   : > { %s519_s14 = sshll.u32 (%p827_p3), %s181_s13, 2 }
  0x1d   : > { %s183_s27 = scalar_lea.vmem (%p827_p3), %s935_s0, %s519_s14 }
  0x1e   : > { %v199_v0 = vld [vmem:[%s183_s27] sm:$0xff] (%p827_p3)  }
  0x1f   : > { %v203_v1 = vld [vmem:[%s183_s27 + $0x20] sm:$0xff]   ;;  %200 = vst [vmem:[%s178_s5] sm:$0xff] %v199_v0  }
  0x20   : > { %v207_v2 = vld [vmem:[%s183_s27 + $0x40] sm:$0xff]   ;;  %204 = vst [vmem:[%s178_s5 + $0x8] sm:$0xff] %v203_v1  }
  0x21   : > { %208 = vst [vmem:[%s178_s5 + $0x10] sm:$0xff] %v207_v2   ;;  %v211_v3 = vld [vmem:[%s183_s27 + $0x60] sm:$0xff]  }
  0x22   : > { %212 = vst [vmem:[%s178_s5 + $0x18] sm:$0xff] %v211_v3  }
  0x23 PF: > { %p520_p12 = scmp.ge.s32.totalorder %s743_s22, 1  ;;  %p252_p13 = scmp.lt.s32.totalorder %s743_s22, 9 }
  0x25   : > { %p253_p0 = pnand %p520_p12, %p252_p13 }
  0x26   : > { %v351_v4 = vld [vmem:[%s938_s3] sm:$0x3] (!%p253_p0)  ;;  %vm356_vm0 = vcmask (!%p253_p0), 1041408   ;;  %s864_s7 = sand.u32 (!%p253_p0), 1, %s719_s16   ;;  %v745_v5 = vmov (!%p253_p0), 0.0   ;;  %vm746_vm1 = vmmov (!%p253_p0), 0  }
  0x27   : > { %256 = sbr.rel (%p253_p0) target bundleno = 288 (0x120), region = 73  ;;  %568 = vmatprep.subr.bf16.mxu0 (!%p253_p0), %v745_v5  ;;  %v358_v6 = vsel (!%p253_p0), %vm356_vm0, %v351_v4, 0  ;;  %570 = vmatprep.mubr.msk.bf16.mxu0 (!%p253_p0), %vm746_vm1, %v745_v5  ;;  %s521_s9 = sshll.u32 (!%p253_p0), %s864_s7, 5  ;;  %v523_v7 = vld [vmem:[%s936_s1] ss:$0 sm:$0xff] (!%p253_p0)  ;;  %vm352_vm2 = vcmask (!%p253_p0), 31744  }
  0x28   : > { %569 = vmatpush3.bf16.msra.mxu0 (!%p253_p0), %v358_v6  ;;  %s261_s12 = scalar_lea.vmem (!%p253_p0), [#allocation2], %s521_s9  ;;  %v524_v16 = vld [vmem:[%s937_s2] ss:$0 sm:$0xff] (!%p253_p0)  ;;  %s522_s23 = sshll.u32 (!%p253_p0), %s864_s7, 3 }
  0x29   : > { %v543_v8 = vld [vmem:[%s261_s12] sm:$0xff] (!%p253_p0)   ;;  %v563_v9 = vld [vmem:[%s261_s12 + $0x8] sm:$0xff] (!%p253_p0)   ;;  %v564_v10 = vld [vmem:[%s261_s12 + $0x10] sm:$0xff] (!%p253_p0)   ;;  %s535_s24 = sshll.u32 (!%p253_p0), %s727_s18, 1  ;;  %s536_s27 = sshll.u32 (!%p253_p0), %s731_s19, 3 }
  0x2a   : > { %v544_v11 = vunpack.c.l.bf16 (!%p253_p0), %v543_v8  ;;  %v545_v12 = vunpack.c.h.bf16 (!%p253_p0), %v543_v8  ;;  %v548_v13 = vunpack.c.l.bf16 (!%p253_p0), %v563_v9  ;;  %v549_v14 = vunpack.c.h.bf16 (!%p253_p0), %v563_v9  ;;  %v565_v15 = vld [vmem:[%s261_s12 + $0x18] sm:$0xff] (!%p253_p0)   ;;  %s424_s5 = sadd.s32 (!%p253_p0), %s536_s27, %s535_s24  ;;  %s283_s28 = scalar_lea.vmem (!%p253_p0), [#allocation3], %s522_s23 }
  0x2b   : > { %v552_v17 = vunpack.c.l.bf16 (!%p253_p0), %v564_v10  ;;  %v553_v18 = vunpack.c.h.bf16 (!%p253_p0), %v564_v10  ;;  %v556_v19 = vunpack.c.l.bf16 (!%p253_p0), %v565_v15  ;;  %v557_v20 = vunpack.c.h.bf16 (!%p253_p0), %v565_v15  ;;  %s427_s6 = sshll.u32 (!%p253_p0), %s283_s28, 4  ;;  %s537_s9 = sshll.u32 (!%p253_p0), %s424_s5, 6  ;;  %s876_s6 = int_to_ptr.vmem [resolvable:$true] %s427_s6 }
  0x2c   : > { %v299_v21 = vmul.f32 (!%p253_p0), %v544_v11, %v523_v7  ;;  %v300_v22 = vmul.f32 (!%p253_p0), %v545_v12, %v523_v7  ;;  %v316_v23 = vmul.f32 (!%p253_p0), %v548_v13, %v523_v7  ;;  %v317_v24 = vmul.f32 (!%p253_p0), %v549_v14, %v523_v7  ;;  %s881_s18 = scalar_lea.hbm (!%p253_p0), %s939_s4, %s537_s9  ;;  %s412_s19 = scalar_lea.sflag (!%p253_p0), [#allocation4], %s864_s7 }
  0x2d   : > { %v329_v25 = vmul.f32 (!%p253_p0), %v552_v17, %v523_v7  ;;  %v330_v26 = vmul.f32 (!%p253_p0), %v553_v18, %v523_v7  ;;  %v340_v27 = vmul.f32 (!%p253_p0), %v556_v19, %v523_v7  ;;  %v341_v28 = vmul.f32 (!%p253_p0), %v557_v20, %v523_v7  ;;  %s649_s12 = scalar_lea.vmem (!%p253_p0), %s876_s6, 128  ;;  %s747_s13 = smov (!%p253_p0), [#allocation3]  }
  0x2e   : > { %v307_v29 = vadd.f32 %v524_v16, %v299_v21  ;;  %v308_v30 = vadd.f32 %v524_v16, %v300_v22  ;;  %v318_v31 = vadd.f32 %v524_v16, %v316_v23  ;;  %v319_v32 = vadd.f32 %v524_v16, %v317_v24  ;;  %p650_p1 = scmp.ne.s32.totalorder %s876_s6, %s649_s12  ;;  %s653_s14 = sshll.u32 %s747_s13, 4  ;;  %s654_s14 = int_to_ptr.vmem [resolvable:$false] %s653_s14 }
  0x2f   : > { %v331_v33 = vadd.f32 %v524_v16, %v329_v25  ;;  %v332_v34 = vadd.f32 %v524_v16, %v330_v26  ;;  %v342_v35 = vadd.f32 %v524_v16, %v340_v27  ;;  %v343_v36 = vadd.f32 %v524_v16, %v341_v28  ;;  %s655_s23 = scalar_lea.vmem %s654_s14, 256  ;;  %p656_p4 = scmp.lt.s32.totalorder %s876_s6, %s654_s14 }
  0x30   : > { %v309_v37 = vmax.f32 %v307_v29, 0.0  ;;  %v310_v38 = vmax.f32 %v308_v30, 0.0  ;;  %v320_v39 = vmax.f32 %v318_v31, 0.0  ;;  %v321_v40 = vmax.f32 %v319_v32, 0.0  ;;  %p651_p2 = pnand %p650_p1, %p835_p8  ;;  %p657_p5 = scmp.lt.s32.totalorder %s655_s23, %s649_s12 }
  0x31   : > { %v333_v41 = vmax.f32 %v331_v33, 0.0  ;;  %v334_v42 = vmax.f32 %v332_v34, 0.0  ;;  %v344_v43 = vmax.f32 %v342_v35, 0.0  ;;  %v345_v44 = vmax.f32 %v343_v36, 0.0 }
  0x32   : > { %v322_v45 = vadd.f32 %v320_v39, %v309_v37  ;;  %v323_v46 = vadd.f32 %v321_v40, %v310_v38  ;;  %p652_p3 = pneg %p651_p2  ;;  %p658_p6 = por %p657_p5, %p656_p4 }
  0x33   : > { %v346_v47 = vadd.f32 %v344_v43, %v333_v41  ;;  %v347_v48 = vadd.f32 %v345_v44, %v334_v42 }
  0x34   : > { %p659_p7 = pnand %p658_p6, %p652_p3 }
  0x35   : > { %v348_v49 = vadd.f32 %v346_v47, %v322_v45  ;;  %v349_v50 = vadd.f32 %v347_v48, %v323_v46 }
  0x37   : > { %v350_v51 = vpack.c.bf16 %v349_v50, %v348_v49 }
  0x39   : > { %571 = vmatmul.mubr.msk.bf16.vlgmr.msra.gmra.mrb[0].mxu0 %vm352_vm2, %v350_v51 }
 0x10c   : > { %v394_v52 = vpop.f32.mrb[0].mxu0 }
 0x10d   : > { %v572_v53 = vpop.f32.mrb[1].mxu0 }
 0x10e   : > { %v397_v54 = vpop.f32.mrb[2].mxu0 }
 0x10f   : > { %v561_v55 = vpack.c.bf16 %v397_v54, %v394_v52  ;;  %v573_v56 = vpop.f32.mrb[3].mxu0 }
 0x111   : > { %562 = vst [vmem:[%s283_s28] sm:$0xff] %v561_v55  }
 0x112   : > { %662 = shalt.err (!%p659_p7)
}
 0x113   : > { %s663_s24 = scalar_lea.hbm %s881_s18, 128  ;;  %s667_s28 = scalar_lea.hbm %s939_s4, 1024 }
 0x114   : > { %p664_p10 = scmp.ne.s32.totalorder %s881_s18, %s663_s24  ;;  %p668_p13 = scmp.lt.u32.totalorder %s881_s18, %s939_s4 }
 0x115   : > { %p669_p0 = scmp.lt.u32.totalorder %s667_s28, %s663_s24  ;;  %p671_p2 = scmp.lt.u32.totalorder %s663_s24, %s881_s18 }
 0x116   : > { %p665_p11 = pnand %p664_p10, %p835_p8 }
 0x117   : > { %p670_p1 = por %p669_p0, %p668_p13 }
 0x118   : > { %p666_p12 = pneg %p665_p11 }
 0x119   : > { %p672_p3 = por %p671_p2, %p670_p1 }
 0x11b   : > { %p673_p4 = pnand %p672_p3, %p666_p12 }
 0x11d   : > { %676 = shalt.err (!%p673_p4)
}
 0x11e   : > { %s748_s11 = smov 64   ;;  %s749_s12 = smov 4  }
 0x11f   : > { %574 = dma.vmem_to_hbm [thread:$0]  (%p835_p8), %s876_s6, 128, %s881_s18, %s412_s19, %s748_s11, %s748_s11, %s749_s12  }
 0x120 PF: > { %p580_p5 = scmp.ge.s32.totalorder %s743_s22, 2  ;;  %s442_s13 = sand.u32 1, %s715_s15  }
 0x121   : > { %s443_s14 = scalar_lea.sflag [#allocation4], %s442_s13 }
 0x122   : > { %p577_p6 = pnand %p580_p5, %p839_p9 }
 0x124   : > { %710 = dma.done.wait (!%p577_p6), %s443_s14, 128  }
 0x125   : > { %712 = vsyncadd (!%p577_p6), %s443_s14, 4294967168  ;;  %s17_s22 = sadd.s32 1, %s743_s22   ;;  %s943_s15 = smov %s719_s16 }
 0x126   : > { %p14_p7 = scmp.ge.s32.totalorder %s17_s22, 10   ;;  %s944_s16 = smov %s723_s17 }
 0x127   : > { %s945_s17 = smov %s847_s8  ;;  %s946_s18 = smov %s735_s20 }
 0x128   : > { %s947_s19 = smov %s739_s21  ;;  %s948_s20 = smov %s951_s25 }
 0x129   : > { %s949_s21 = smov %s955_s26  ;;  %16 = sbr.rel (!%p14_p7) target bundleno = 5 (0x5), region = 120 }
 0x130   :  { %448 = vsyncpa [#allocation4], 1 }
 0x131   :  { %450 = vsyncpa [#allocation4 + $0x1], 1 }

</bundles_post_ra>
